<compile_context>
chip_gen: v6e
topology: v6e:2x2x1
jax: 0.10.0
libtpu: 0.0.40
codegen_flags: <defaults>
</compile_context>

<pallas_src>
import functools

import jax
import jax.numpy as jnp
import numpy as np
from jax import lax
from jax.experimental import pallas as pl
from jax.experimental.pallas import tpu as pltpu

LEAKY_SLOPE = 0.1
BN_EPS = 0.001


def _leaky(x):
    return jnp.where(x > 0, x, LEAKY_SLOPE * x)


def _shift_flat(y, d):
    """z[:, l] = y[:, l + d] if 0 <= l + d < L else 0 (exact zero-filled lane shift)."""
    if d == 0:
        return y
    pad = jnp.zeros((y.shape[0], abs(d)), y.dtype)
    if d > 0:
        return jnp.concatenate([y[:, d:], pad], axis=1)
    return jnp.concatenate([pad, y[:, :d]], axis=1)


def conv_bottleneck_kernel(x_ref, w1_ref, b1_ref, w2_ref, b2_ref, cmask_ref, o_ref, *, W):
    """One batch block per grid step.

    x_ref    : (NB, Cin, H*W)   input block (channels on sublanes, H*W on lanes), f32
    w1_ref   : (Cb, Cin)        1x1 conv weight, BN1 scale folded in, bf16
    b1_ref   : (Cb, 1)          folded BN1 bias, f32
    w2_ref   : (3, 3, Cout, Cb) 3x3 conv weight [kh, kw, :, :], BN2 scale folded in, bf16
    b2_ref   : (Cout, 1)        folded BN2 bias, f32
    cmask_ref: (2, H*W)         bf16 {0,1} masks: row 0 keeps cols != W-1 (for dx=-1),
                                row 1 keeps cols != 0 (for dx=+1)
    o_ref    : (NB, Cout, H*W)  output block, f32
    """
    NB = x_ref.shape[0]
    Cout = w2_ref.shape[2]
    HW = x_ref.shape[2]

    mask_neg = cmask_ref[0:1, :]      # pre-mask for dx = -1 taps (zero input col W-1)
    mask_pos = cmask_ref[1:2, :]      # pre-mask for dx = +1 taps (zero input col 0)

    for b in range(NB):
        # ---- conv1 (1x1) + BN1 + LeakyReLU: one MXU matmul, K = Cin ----
        y1 = jnp.dot(w1_ref[...], x_ref[b].astype(jnp.bfloat16),
                     preferred_element_type=jnp.float32)            # (Cb, HW) f32
        y1 = _leaky(y1 + b1_ref[...]).astype(jnp.bfloat16)

        # Pre-masked copies shared by the three dy taps of each dx.
        y1_by_dx = {-1: y1 * mask_neg, 0: y1, 1: y1 * mask_pos}

        # ---- conv2 (3x3, pad=1) + BN2 + LeakyReLU: nine accumulated matmuls ----
        # Tap (dy, dx) = zero-filled lane shift by dy*W + dx of the flattened H*W axis.
        # Row-boundary overreads fall into the zero fill; column-boundary overreads are
        # removed by the dx pre-mask, so the result matches zero padding exactly.
        acc = jnp.zeros((Cout, HW), jnp.float32)
        for dy in (-1, 0, 1):
            for dx in (-1, 0, 1):
                tap = _shift_flat(y1_by_dx[dx], dy * W + dx)         # (Cb, HW) bf16
                acc = acc + jnp.dot(w2_ref[dy + 1, dx + 1], tap,
                                    preferred_element_type=jnp.float32)
        y2 = _leaky(acc + b2_ref[...])                               # (Cout, HW) f32

        # ---- residual shortcut (Cin == Cout): re-read x from VMEM ----
        o_ref[b] = (x_ref[b] + y2).astype(o_ref.dtype)


def _pick_batch_block(n, per_image_io_bytes, const_bytes, vmem_budget):
    """Largest divisor of n keeping >= min(n, 8) grid steps (>= 4 per TensorCore on
    dual-core parts) whose double-buffered blocks fit the per-chip VMEM budget."""
    target_steps = min(n, 8)
    best = 1
    for nb in range(1, n + 1):
        if n % nb:
            continue
        if n // nb < target_steps:
            continue
        need = 2 * nb * per_image_io_bytes + 2 * const_bytes + (2 << 20)
        if need <= vmem_budget:
            best = nb
    return best


def conv_bottleneck(x_nchw, w1_k, b1_k, w2_k, b2_k, *, batch_block=None):
    """x_nchw: (N, C, H, W) f32.  w1_k: (Cb, Cin) bf16 (BN1 scale folded).
    b1_k: (Cb, 1) f32.  w2_k: (3, 3, Cout, Cb) bf16 (BN2 scale folded).
    b2_k: (Cout, 1) f32.  Returns (N, C, H, W) f32."""
    N, C, H, W = x_nchw.shape
    Cb = w1_k.shape[0]
    Cout = w2_k.shape[2]
    assert C == Cout, "bottleneck requires input channels == output channels"
    HW = H * W

    # Free relayout: channels on sublanes, flattened spatial on lanes (lane-dense I/O).
    x_flat = x_nchw.reshape(N, C, HW)

    # {0,1} column masks for the dx = -1 / +1 taps (precomputed; avoids in-kernel iota % W).
    col = jnp.arange(HW) % W
    cmask = jnp.stack([col != (W - 1), col != 0]).astype(jnp.bfloat16)   # (2, HW)

    # VMEM-aware batch-block / grid selection (v7x: 64 MiB/core; v5e/v6e: 128 MiB).
    try:
        vmem_cap = int(pltpu.get_tpu_info().vmem_capacity_bytes)
    except Exception:
        vmem_cap = 64 << 20   # conservative fallback (v7x per-core VMEM)
    vmem_budget = (vmem_cap * 3) // 4
    per_image_io = 2 * C * HW * 4                        # f32 input block + output block
    const_bytes = (w1_k.size + w2_k.size + cmask.size) * 2 + (b1_k.size + b2_k.size) * 4
    nb = (_pick_batch_block(N, per_image_io, const_bytes, vmem_budget)
          if batch_block is None else batch_block)
    assert N % nb == 0
    grid = (N // nb,)
    # TODO(synk): for very large C*H*W a single image may exceed VMEM; that would need an
    # extra spatial grid axis over H with a 1-row halo.

    vmem_limit = int(min(max(2 * nb * per_image_io + 2 * const_bytes + (4 << 20), 8 << 20),
                         vmem_budget))

    kernel = functools.partial(conv_bottleneck_kernel, W=W)
    out_flat = pl.pallas_call(
        kernel,
        out_shape=jax.ShapeDtypeStruct((N, C, HW), x_flat.dtype),
        grid_spec=pltpu.PrefetchScalarGridSpec(
            num_scalar_prefetch=0,
            grid=grid,
            in_specs=[
                pl.BlockSpec((nb, C, HW), lambda n: (n, 0, 0)),
                pl.BlockSpec((Cb, C), lambda n: (0, 0)),
                pl.BlockSpec((Cb, 1), lambda n: (0, 0)),
                pl.BlockSpec((3, 3, Cout, Cb), lambda n: (0, 0, 0, 0)),
                pl.BlockSpec((Cout, 1), lambda n: (0, 0)),
                pl.BlockSpec((2, HW), lambda n: (0, 0)),
            ],
            out_specs=pl.BlockSpec((nb, C, HW), lambda n: (n, 0, 0)),
        ),
        compiler_params=pltpu.CompilerParams(
            dimension_semantics=("parallel",),
            vmem_limit_bytes=vmem_limit),
    )(x_flat, w1_k, b1_k, w2_k, b2_k, cmask)

    return out_flat.reshape(N, C, H, W)


def reference_forward(x_nchw, w1_oihw, s1, b1, w2_oihw, s2, b2):
    """Pure-JAX f32 reference matching PyTorch semantics (NCHW, OIHW, cross-correlation)."""
    dn = ('NCHW', 'OIHW', 'NCHW')
    y1 = lax.conv_general_dilated(x_nchw, w1_oihw, (1, 1), [(0, 0), (0, 0)],
                                  dimension_numbers=dn)
    y1 = _leaky(y1 * s1[None, :, None, None] + b1[None, :, None, None])
    y2 = lax.conv_general_dilated(y1, w2_oihw, (1, 1), [(1, 1), (1, 1)],
                                  dimension_numbers=dn)
    y2 = _leaky(y2 * s2[None, :, None, None] + b2[None, :, None, None])
    return x_nchw + y2


if __name__ == "__main__":
    # Small shapes consistent with the module (input_channels == output_channels).
    N, C, H, W = 4, 16, 16, 16
    compress_ratio = 0.5
    Cb = int(C * compress_ratio)                    # bottleneck size = 8
    Cout = C

    key = jax.random.PRNGKey(0)
    ks = jax.random.split(key, 11)

    x = jax.random.normal(ks[0], (N, C, H, W), jnp.float32)

    # Conv weights in PyTorch OIHW layout (bias=False in ConvBlock).
    w1_oihw = jax.random.normal(ks[1], (Cb, C, 1, 1), jnp.float32) * 0.2
    w2_oihw = jax.random.normal(ks[2], (Cout, Cb, 3, 3), jnp.float32) * 0.2

    # BatchNorm parameters (gamma, beta, running_mean, running_var), folded to scale/bias.
    g1 = jax.random.uniform(ks[3], (Cb,), minval=0.5, maxval=1.5)
    be1 = jax.random.normal(ks[4], (Cb,)) * 0.1
    m1 = jax.random.normal(ks[5], (Cb,)) * 0.1
    v1 = jax.random.uniform(ks[6], (Cb,), minval=0.5, maxval=1.5)
    g2 = jax.random.uniform(ks[7], (Cout,), minval=0.5, maxval=1.5)
    be2 = jax.random.normal(ks[8], (Cout,)) * 0.1
    m2 = jax.random.normal(ks[9], (Cout,)) * 0.1
    v2 = jax.random.uniform(ks[10], (Cout,), minval=0.5, maxval=1.5)

    s1 = g1 / jnp.sqrt(v1 + BN_EPS)
    b1 = be1 - m1 * s1
    s2 = g2 / jnp.sqrt(v2 + BN_EPS)
    b2 = be2 - m2 * s2

    # Pack weights for the kernel: BN scales folded into the bf16 matmul weights,
    # biases kept in f32.
    w1_k = (s1[:, None] * w1_oihw[:, :, 0, 0]).astype(jnp.bfloat16)           # (Cb, Cin)
    b1_k = b1.reshape(Cb, 1).astype(jnp.float32)
    w2_k = (jnp.transpose(w2_oihw, (2, 3, 0, 1))
            * s2[None, None, :, None]).astype(jnp.bfloat16)                   # (3,3,Cout,Cb)
    b2_k = b2.reshape(Cout, 1).astype(jnp.float32)

    out = conv_bottleneck(x, w1_k, b1_k, w2_k, b2_k)
    out = jax.block_until_ready(out)

    ref = reference_forward(x, w1_oihw, s1, b1, w2_oihw, s2, b2)
    ref = jax.block_until_ready(ref)

    # bf16 MXU weights/activations (f32 accumulate) -> looser tolerance than pure f32.
    np.testing.assert_allclose(np.asarray(out), np.asarray(ref), atol=5e-2, rtol=5e-2)
    print("KERNEL_OK")
</pallas_src>

<mosaic_0001>
module attributes {stable_mosaic.version = 11 : i64} {
  func.func @conv_bottleneck_kernel(%arg0: i32, %arg1: memref<1x16x256xf32, #tpu.memory_space<vmem>>, %arg2: memref<8x16xbf16, #tpu.memory_space<vmem>>, %arg3: memref<8x1xf32, #tpu.memory_space<vmem>>, %arg4: memref<3x3x16x8xbf16, #tpu.memory_space<vmem>>, %arg5: memref<16x1xf32, #tpu.memory_space<vmem>>, %arg6: memref<2x256xbf16, #tpu.memory_space<vmem>>, %arg7: memref<1x16x256xf32, #tpu.memory_space<vmem>>) attributes {dimension_semantics = [#tpu.dimension_semantics<parallel>], iteration_bounds = array<i64: 4>, scalar_prefetch = 0 : i64, scratch_operands = 0 : i64, tpu.core_type = #tpu.core_type<tc>, window_params = [{transform_indices = @transform_0, window_bounds = array<i64: 1, 16, 256>}, {pipeline_mode = #tpu.pipeline_mode<synchronous>, transform_indices = @transform_1, window_bounds = array<i64: 8, 16>}, {pipeline_mode = #tpu.pipeline_mode<synchronous>, transform_indices = @transform_2, window_bounds = array<i64: 8, 1>}, {pipeline_mode = #tpu.pipeline_mode<synchronous>, transform_indices = @transform_3, window_bounds = array<i64: 3, 3, 16, 8>}, {pipeline_mode = #tpu.pipeline_mode<synchronous>, transform_indices = @transform_4, window_bounds = array<i64: 16, 1>}, {pipeline_mode = #tpu.pipeline_mode<synchronous>, transform_indices = @transform_5, window_bounds = array<i64: 2, 256>}, {transform_indices = @transform_6, window_bounds = array<i64: 1, 16, 256>}]} {
    %c0 = arith.constant 0 : index
    %c0_0 = arith.constant 0 : index
    %0 = vector.load %arg6[%c0, %c0_0] : memref<2x256xbf16, #tpu.memory_space<vmem>>, vector<1x256xbf16>
    %c1 = arith.constant 1 : index
    %c0_1 = arith.constant 0 : index
    %1 = vector.load %arg6[%c1, %c0_1] : memref<2x256xbf16, #tpu.memory_space<vmem>>, vector<1x256xbf16>
    %c0_2 = arith.constant 0 : index
    %c0_3 = arith.constant 0 : index
    %2 = vector.load %arg2[%c0_2, %c0_3] : memref<8x16xbf16, #tpu.memory_space<vmem>>, vector<8x16xbf16>
    %c0_4 = arith.constant 0 : index
    %c0_5 = arith.constant 0 : index
    %c0_6 = arith.constant 0 : index
    %3 = vector.load %arg1[%c0_4, %c0_5, %c0_6] : memref<1x16x256xf32, #tpu.memory_space<vmem>>, vector<1x16x256xf32>
    %4 = vector.shape_cast %3 : vector<1x16x256xf32> to vector<16x256xf32>
    %5 = arith.truncf %4 : vector<16x256xf32> to vector<16x256xbf16>
    %cst = arith.constant dense<0.000000e+00> : vector<8x256xf32>
    %6 = tpu.matmul %2, %5, %cst {dimension_numbers = #tpu.dot_dimension_numbers<[1], [0], [0], [1], [0, 0, 1, 1], [], []>} : vector<8x16xbf16>, vector<16x256xbf16>, vector<8x256xf32> -> vector<8x256xf32>
    %c0_7 = arith.constant 0 : index
    %c0_8 = arith.constant 0 : index
    %7 = vector.load %arg3[%c0_7, %c0_8] : memref<8x1xf32, #tpu.memory_space<vmem>>, vector<8x1xf32>
    %8 = vector.broadcast %7 : vector<8x1xf32> to vector<8x256xf32>
    %9 = arith.addf %6, %8 : vector<8x256xf32>
    %cst_9 = arith.constant 0.000000e+00 : f32
    %10 = vector.broadcast %cst_9 : f32 to vector<8x256xf32>
    %11 = arith.cmpf ogt, %9, %10 : vector<8x256xf32>
    %cst_10 = arith.constant 1.000000e-01 : f32
    %12 = vector.broadcast %cst_10 : f32 to vector<8x256xf32>
    %13 = arith.mulf %12, %9 : vector<8x256xf32>
    %14 = arith.select %11, %9, %13 : vector<8x256xi1>, vector<8x256xf32>
    %15 = arith.truncf %14 : vector<8x256xf32> to vector<8x256xbf16>
    %16 = vector.broadcast %0 : vector<1x256xbf16> to vector<8x256xbf16>
    %17 = arith.mulf %15, %16 : vector<8x256xbf16>
    %18 = vector.broadcast %1 : vector<1x256xbf16> to vector<8x256xbf16>
    %19 = arith.mulf %15, %18 : vector<8x256xbf16>
    %cst_11 = arith.constant 0.000000e+00 : f32
    %20 = vector.broadcast %cst_11 : f32 to vector<16x256xf32>
    %cst_12 = arith.constant 0.000000e+00 : bf16
    %21 = vector.broadcast %cst_12 : bf16 to vector<8x17xbf16>
    %22 = vector.extract_strided_slice %17 {offsets = [0, 0], sizes = [8, 239], strides = [1, 1]} : vector<8x256xbf16> to vector<8x239xbf16>
    %23 = tpu.concatenate %21, %22 in 1 : vector<8x17xbf16>, vector<8x239xbf16> -> vector<8x256xbf16>
    %c0_13 = arith.constant 0 : index
    %c0_14 = arith.constant 0 : index
    %c0_15 = arith.constant 0 : index
    %c0_16 = arith.constant 0 : index
    %24 = vector.load %arg4[%c0_13, %c0_14, %c0_15, %c0_16] : memref<3x3x16x8xbf16, #tpu.memory_space<vmem>>, vector<1x1x16x8xbf16>
    %25 = vector.shape_cast %24 : vector<1x1x16x8xbf16> to vector<16x8xbf16>
    %cst_17 = arith.constant dense<0.000000e+00> : vector<16x256xf32>
    %26 = tpu.matmul %25, %23, %cst_17 {dimension_numbers = #tpu.dot_dimension_numbers<[1], [0], [0], [1], [0, 0, 1, 1], [], []>} : vector<16x8xbf16>, vector<8x256xbf16>, vector<16x256xf32> -> vector<16x256xf32>
    %27 = arith.addf %20, %26 : vector<16x256xf32>
    %cst_18 = arith.constant 0.000000e+00 : bf16
    %28 = vector.broadcast %cst_18 : bf16 to vector<8x16xbf16>
    %29 = vector.extract_strided_slice %15 {offsets = [0, 0], sizes = [8, 240], strides = [1, 1]} : vector<8x256xbf16> to vector<8x240xbf16>
    %30 = tpu.concatenate %28, %29 in 1 : vector<8x16xbf16>, vector<8x240xbf16> -> vector<8x256xbf16>
    %c0_19 = arith.constant 0 : index
    %c1_20 = arith.constant 1 : index
    %c0_21 = arith.constant 0 : index
    %c0_22 = arith.constant 0 : index
    %31 = vector.load %arg4[%c0_19, %c1_20, %c0_21, %c0_22] : memref<3x3x16x8xbf16, #tpu.memory_space<vmem>>, vector<1x1x16x8xbf16>
    %32 = vector.shape_cast %31 : vector<1x1x16x8xbf16> to vector<16x8xbf16>
    %cst_23 = arith.constant dense<0.000000e+00> : vector<16x256xf32>
    %33 = tpu.matmul %32, %30, %cst_23 {dimension_numbers = #tpu.dot_dimension_numbers<[1], [0], [0], [1], [0, 0, 1, 1], [], []>} : vector<16x8xbf16>, vector<8x256xbf16>, vector<16x256xf32> -> vector<16x256xf32>
    %34 = arith.addf %27, %33 : vector<16x256xf32>
    %cst_24 = arith.constant 0.000000e+00 : bf16
    %35 = vector.broadcast %cst_24 : bf16 to vector<8x15xbf16>
    %36 = vector.extract_strided_slice %19 {offsets = [0, 0], sizes = [8, 241], strides = [1, 1]} : vector<8x256xbf16> to vector<8x241xbf16>
    %37 = tpu.concatenate %35, %36 in 1 : vector<8x15xbf16>, vector<8x241xbf16> -> vector<8x256xbf16>
    %c0_25 = arith.constant 0 : index
    %c2 = arith.constant 2 : index
    %c0_26 = arith.constant 0 : index
    %c0_27 = arith.constant 0 : index
    %38 = vector.load %arg4[%c0_25, %c2, %c0_26, %c0_27] : memref<3x3x16x8xbf16, #tpu.memory_space<vmem>>, vector<1x1x16x8xbf16>
    %39 = vector.shape_cast %38 : vector<1x1x16x8xbf16> to vector<16x8xbf16>
    %cst_28 = arith.constant dense<0.000000e+00> : vector<16x256xf32>
    %40 = tpu.matmul %39, %37, %cst_28 {dimension_numbers = #tpu.dot_dimension_numbers<[1], [0], [0], [1], [0, 0, 1, 1], [], []>} : vector<16x8xbf16>, vector<8x256xbf16>, vector<16x256xf32> -> vector<16x256xf32>
    %41 = arith.addf %34, %40 : vector<16x256xf32>
    %cst_29 = arith.constant 0.000000e+00 : bf16
    %42 = vector.broadcast %cst_29 : bf16 to vector<8x1xbf16>
    %43 = vector.extract_strided_slice %17 {offsets = [0, 0], sizes = [8, 255], strides = [1, 1]} : vector<8x256xbf16> to vector<8x255xbf16>
    %44 = tpu.concatenate %42, %43 in 1 : vector<8x1xbf16>, vector<8x255xbf16> -> vector<8x256xbf16>
    %c1_30 = arith.constant 1 : index
    %c0_31 = arith.constant 0 : index
    %c0_32 = arith.constant 0 : index
    %c0_33 = arith.constant 0 : index
    %45 = vector.load %arg4[%c1_30, %c0_31, %c0_32, %c0_33] : memref<3x3x16x8xbf16, #tpu.memory_space<vmem>>, vector<1x1x16x8xbf16>
    %46 = vector.shape_cast %45 : vector<1x1x16x8xbf16> to vector<16x8xbf16>
    %cst_34 = arith.constant dense<0.000000e+00> : vector<16x256xf32>
    %47 = tpu.matmul %46, %44, %cst_34 {dimension_numbers = #tpu.dot_dimension_numbers<[1], [0], [0], [1], [0, 0, 1, 1], [], []>} : vector<16x8xbf16>, vector<8x256xbf16>, vector<16x256xf32> -> vector<16x256xf32>
    %48 = arith.addf %41, %47 : vector<16x256xf32>
    %c1_35 = arith.constant 1 : index
    %c1_36 = arith.constant 1 : index
    %c0_37 = arith.constant 0 : index
    %c0_38 = arith.constant 0 : index
    %49 = vector.load %arg4[%c1_35, %c1_36, %c0_37, %c0_38] : memref<3x3x16x8xbf16, #tpu.memory_space<vmem>>, vector<1x1x16x8xbf16>
    %50 = vector.shape_cast %49 : vector<1x1x16x8xbf16> to vector<16x8xbf16>
    %cst_39 = arith.constant dense<0.000000e+00> : vector<16x256xf32>
    %51 = tpu.matmul %50, %15, %cst_39 {dimension_numbers = #tpu.dot_dimension_numbers<[1], [0], [0], [1], [0, 0, 1, 1], [], []>} : vector<16x8xbf16>, vector<8x256xbf16>, vector<16x256xf32> -> vector<16x256xf32>
    %52 = arith.addf %48, %51 : vector<16x256xf32>
    %cst_40 = arith.constant 0.000000e+00 : bf16
    %53 = vector.broadcast %cst_40 : bf16 to vector<8x1xbf16>
    %54 = vector.extract_strided_slice %19 {offsets = [0, 1], sizes = [8, 255], strides = [1, 1]} : vector<8x256xbf16> to vector<8x255xbf16>
    %55 = tpu.concatenate %54, %53 in 1 : vector<8x255xbf16>, vector<8x1xbf16> -> vector<8x256xbf16>
    %c1_41 = arith.constant 1 : index
    %c2_42 = arith.constant 2 : index
    %c0_43 = arith.constant 0 : index
    %c0_44 = arith.constant 0 : index
    %56 = vector.load %arg4[%c1_41, %c2_42, %c0_43, %c0_44] : memref<3x3x16x8xbf16, #tpu.memory_space<vmem>>, vector<1x1x16x8xbf16>
    %57 = vector.shape_cast %56 : vector<1x1x16x8xbf16> to vector<16x8xbf16>
    %cst_45 = arith.constant dense<0.000000e+00> : vector<16x256xf32>
    %58 = tpu.matmul %57, %55, %cst_45 {dimension_numbers = #tpu.dot_dimension_numbers<[1], [0], [0], [1], [0, 0, 1, 1], [], []>} : vector<16x8xbf16>, vector<8x256xbf16>, vector<16x256xf32> -> vector<16x256xf32>
    %59 = arith.addf %52, %58 : vector<16x256xf32>
    %cst_46 = arith.constant 0.000000e+00 : bf16
    %60 = vector.broadcast %cst_46 : bf16 to vector<8x15xbf16>
    %61 = vector.extract_strided_slice %17 {offsets = [0, 15], sizes = [8, 241], strides = [1, 1]} : vector<8x256xbf16> to vector<8x241xbf16>
    %62 = tpu.concatenate %61, %60 in 1 : vector<8x241xbf16>, vector<8x15xbf16> -> vector<8x256xbf16>
    %c2_47 = arith.constant 2 : index
    %c0_48 = arith.constant 0 : index
    %c0_49 = arith.constant 0 : index
    %c0_50 = arith.constant 0 : index
    %63 = vector.load %arg4[%c2_47, %c0_48, %c0_49, %c0_50] : memref<3x3x16x8xbf16, #tpu.memory_space<vmem>>, vector<1x1x16x8xbf16>
    %64 = vector.shape_cast %63 : vector<1x1x16x8xbf16> to vector<16x8xbf16>
    %cst_51 = arith.constant dense<0.000000e+00> : vector<16x256xf32>
    %65 = tpu.matmul %64, %62, %cst_51 {dimension_numbers = #tpu.dot_dimension_numbers<[1], [0], [0], [1], [0, 0, 1, 1], [], []>} : vector<16x8xbf16>, vector<8x256xbf16>, vector<16x256xf32> -> vector<16x256xf32>
    %66 = arith.addf %59, %65 : vector<16x256xf32>
    %cst_52 = arith.constant 0.000000e+00 : bf16
    %67 = vector.broadcast %cst_52 : bf16 to vector<8x16xbf16>
    %68 = vector.extract_strided_slice %15 {offsets = [0, 16], sizes = [8, 240], strides = [1, 1]} : vector<8x256xbf16> to vector<8x240xbf16>
    %69 = tpu.concatenate %68, %67 in 1 : vector<8x240xbf16>, vector<8x16xbf16> -> vector<8x256xbf16>
    %c2_53 = arith.constant 2 : index
    %c1_54 = arith.constant 1 : index
    %c0_55 = arith.constant 0 : index
    %c0_56 = arith.constant 0 : index
    %70 = vector.load %arg4[%c2_53, %c1_54, %c0_55, %c0_56] : memref<3x3x16x8xbf16, #tpu.memory_space<vmem>>, vector<1x1x16x8xbf16>
    %71 = vector.shape_cast %70 : vector<1x1x16x8xbf16> to vector<16x8xbf16>
    %cst_57 = arith.constant dense<0.000000e+00> : vector<16x256xf32>
    %72 = tpu.matmul %71, %69, %cst_57 {dimension_numbers = #tpu.dot_dimension_numbers<[1], [0], [0], [1], [0, 0, 1, 1], [], []>} : vector<16x8xbf16>, vector<8x256xbf16>, vector<16x256xf32> -> vector<16x256xf32>
    %73 = arith.addf %66, %72 : vector<16x256xf32>
    %cst_58 = arith.constant 0.000000e+00 : bf16
    %74 = vector.broadcast %cst_58 : bf16 to vector<8x17xbf16>
    %75 = vector.extract_strided_slice %19 {offsets = [0, 17], sizes = [8, 239], strides = [1, 1]} : vector<8x256xbf16> to vector<8x239xbf16>
    %76 = tpu.concatenate %75, %74 in 1 : vector<8x239xbf16>, vector<8x17xbf16> -> vector<8x256xbf16>
    %c2_59 = arith.constant 2 : index
    %c2_60 = arith.constant 2 : index
    %c0_61 = arith.constant 0 : index
    %c0_62 = arith.constant 0 : index
    %77 = vector.load %arg4[%c2_59, %c2_60, %c0_61, %c0_62] : memref<3x3x16x8xbf16, #tpu.memory_space<vmem>>, vector<1x1x16x8xbf16>
    %78 = vector.shape_cast %77 : vector<1x1x16x8xbf16> to vector<16x8xbf16>
    %cst_63 = arith.constant dense<0.000000e+00> : vector<16x256xf32>
    %79 = tpu.matmul %78, %76, %cst_63 {dimension_numbers = #tpu.dot_dimension_numbers<[1], [0], [0], [1], [0, 0, 1, 1], [], []>} : vector<16x8xbf16>, vector<8x256xbf16>, vector<16x256xf32> -> vector<16x256xf32>
    %80 = arith.addf %73, %79 : vector<16x256xf32>
    %c0_64 = arith.constant 0 : index
    %c0_65 = arith.constant 0 : index
    %81 = vector.load %arg5[%c0_64, %c0_65] : memref<16x1xf32, #tpu.memory_space<vmem>>, vector<16x1xf32>
    %82 = vector.broadcast %81 : vector<16x1xf32> to vector<16x256xf32>
    %83 = arith.addf %80, %82 : vector<16x256xf32>
    %cst_66 = arith.constant 0.000000e+00 : f32
    %84 = vector.broadcast %cst_66 : f32 to vector<16x256xf32>
    %85 = arith.cmpf ogt, %83, %84 : vector<16x256xf32>
    %cst_67 = arith.constant 1.000000e-01 : f32
    %86 = vector.broadcast %cst_67 : f32 to vector<16x256xf32>
    %87 = arith.mulf %86, %83 : vector<16x256xf32>
    %88 = arith.select %85, %83, %87 : vector<16x256xi1>, vector<16x256xf32>
    %c0_68 = arith.constant 0 : index
    %c0_69 = arith.constant 0 : index
    %c0_70 = arith.constant 0 : index
    %89 = vector.load %arg1[%c0_68, %c0_69, %c0_70] : memref<1x16x256xf32, #tpu.memory_space<vmem>>, vector<1x16x256xf32>
    %90 = vector.shape_cast %89 : vector<1x16x256xf32> to vector<16x256xf32>
    %91 = arith.addf %90, %88 : vector<16x256xf32>
    %c0_71 = arith.constant 0 : index
    %c0_72 = arith.constant 0 : index
    %c0_73 = arith.constant 0 : index
    %92 = vector.load %arg7[%c0_71, %c0_72, %c0_73] : memref<1x16x256xf32, #tpu.memory_space<vmem>>, vector<1x16x256xf32>
    %93 = vector.shape_cast %92 : vector<1x16x256xf32> to vector<16x256xf32>
    %94 = vector.shape_cast %91 : vector<16x256xf32> to vector<1x16x256xf32>
    tpu.vector_store %arg7[%c0_71, %c0_72, %c0_73], %94 {strides = array<i32>} : memref<1x16x256xf32, #tpu.memory_space<vmem>>, vector<1x16x256xf32>,
    return
  }
  func.func @transform_0(%arg0: i32) -> (i32, i32, i32) {
    %c0_i32 = arith.constant 0 : i32
    %c0_i32_0 = arith.constant 0 : i32
    %c0_i32_1 = arith.constant 0 : i32
    return %arg0, %c0_i32, %c0_i32_0 : i32, i32, i32
  }
  func.func @transform_1(%arg0: i32) -> (i32, i32) {
    %c0_i32 = arith.constant 0 : i32
    %c0_i32_0 = arith.constant 0 : i32
    %c0_i32_1 = arith.constant 0 : i32
    return %c0_i32, %c0_i32_0 : i32, i32
  }
  func.func @transform_2(%arg0: i32) -> (i32, i32) {
    %c0_i32 = arith.constant 0 : i32
    %c0_i32_0 = arith.constant 0 : i32
    %c0_i32_1 = arith.constant 0 : i32
    return %c0_i32, %c0_i32_0 : i32, i32
  }
  func.func @transform_3(%arg0: i32) -> (i32, i32, i32, i32) {
    %c0_i32 = arith.constant 0 : i32
    %c0_i32_0 = arith.constant 0 : i32
    %c0_i32_1 = arith.constant 0 : i32
    %c0_i32_2 = arith.constant 0 : i32
    %c0_i32_3 = arith.constant 0 : i32
    return %c0_i32, %c0_i32_0, %c0_i32_1, %c0_i32_2 : i32, i32, i32, i32
  }
  func.func @transform_4(%arg0: i32) -> (i32, i32) {
    %c0_i32 = arith.constant 0 : i32
    %c0_i32_0 = arith.constant 0 : i32
    %c0_i32_1 = arith.constant 0 : i32
    return %c0_i32, %c0_i32_0 : i32, i32
  }
  func.func @transform_5(%arg0: i32) -> (i32, i32) {
    %c0_i32 = arith.constant 0 : i32
    %c0_i32_0 = arith.constant 0 : i32
    %c0_i32_1 = arith.constant 0 : i32
    return %c0_i32, %c0_i32_0 : i32, i32
  }
  func.func @transform_6(%arg0: i32) -> (i32, i32, i32) {
    %c0_i32 = arith.constant 0 : i32
    %c0_i32_0 = arith.constant 0 : i32
    %c0_i32_1 = arith.constant 0 : i32
    return %arg0, %c0_i32, %c0_i32_0 : i32, i32, i32
  }
}

</mosaic_0001>

<bundles_post_ra>
// kernel: tpu_custom_call.1
= control target key start
LH: loop header
LB: loop body
LE: loop exit
PB: predicated region body
PF: predicated region fallthrough
CT: control target
= control target key end

     0   :  { %11 = vsyncpa [#allocation3], 0  ;;  %s1578_s0 = inlined_call_operand.vmem [shape: f32[4,16,256], index: 0, kind: input, shape index: {}]   ;;  %s1579_s1 = inlined_call_operand.vmem [shape: bf16[8,16], index: 1, kind: input, shape index: {}]   ;;  %s1580_s2 = inlined_call_operand.vmem [shape: f32[8,1], index: 2, kind: input, shape index: {}]   ;;  %s1581_s3 = inlined_call_operand.vmem [shape: bf16[3,3,16,8], index: 3, kind: input, shape index: {}]   ;;  %s1582_s4 = inlined_call_operand.vmem [shape: f32[16,1], index: 4, kind: input, shape index: {}]   ;;  %s1583_s5 = inlined_call_operand.vmem [shape: bf16[2,256], index: 5, kind: input, shape index: {}]   ;;  %s1584_s6 = inlined_call_operand.hbm [shape: f32[4,16,256], index: 6, kind: output, shape index: {}]  }
   0x1   :  { %13 = vsyncpa [#allocation3 + $0x1], 0  ;;  %s1353_s21 = smov 0   ;;  %s1355_s22 = smov 0  }
   0x2   :  { %s1357_s23 = smov 0   ;;  %s1359_s24 = smov 0  }
   0x3 LB: > { %s1374_s25 = sadd.s32 4294967295, %s1304_s24   ;;  %s1124_s26 = sadd.s32 4294967294, %s1304_s24   ;;  %s1304_s24 = sphi %s1359_s24, %s1590_s24   ;;  %s1300_s23 = sphi %s1357_s23, %s1589_s23   ;;  %s1296_s22 = sphi %s1355_s22, %s1588_s22   ;;  %s1292_s21 = sphi %s1353_s21, %s1587_s21  }
   0x4   : > { %s1378_s27 = sadd.s32 1, %s1304_s24   ;;  %s157_s28 = sadd.s32 1, %s1300_s23 }
   0x5   : > { %s154_s29 = ssub.s32 %s1304_s24, %s1378_s27  ;;  %p167_p0 = scmp.ne.s32.totalorder %s1300_s23, %s1296_s22 }
   0x6   : > { %p155_p1 = scmp.eq.s32.totalorder %s154_s29, 0  ;;  %p168_p2 = scmp.eq.s32.totalorder %s1374_s25, 3 }
   0x7   : > { %p173_p3 = scmp.ne.s32.totalorder %s1296_s22, %s1292_s21  ;;  %p174_p4 = scmp.eq.s32.totalorder %s1124_s26, 3 }
   0x8   : > { %s1389_s30 = scalar_select %p155_p1, %s1300_s23, %s157_s28  }
   0x9   : > { %p1391_p5 = por %p168_p2, %p167_p0  ;;  %p1395_p6 = por %p174_p4, %p173_p3 }
   0xa   : > { %p1127_p7 = scmp.ge.s32.totalorder %s1304_s24, 1  ;;  %p215_p8 = scmp.lt.s32.totalorder %s1304_s24, 5 }
   0xc   : > { %p216_p9 = pnand %p1127_p7, %p215_p8 }
   0xd   : > { %p245_p10 = scmp.lt.s32.totalorder (!%p216_p9), %s1374_s25, 3  ;;  %s1308_s20 = smov (!%p216_p9), 16  }
   0xe   : > { %219 = sbr.rel (%p216_p9) target bundleno = 607 (0x25f), region = 44  ;;  %s1309_s26 = smov (!%p216_p9), 17  }
   0xf   : > { %s1310_s28 = smov (!%p216_p9), 15   ;;  %s1311_s29 = smov (!%p216_p9), 1  }
  0x10   : > { %s1312_s9 = smov (!%p216_p9), 127   ;;  %s1313_s10 = smov (!%p216_p9), 113  }
  0x11   : > { %s1316_s16 = smov (!%p216_p9), [#allocation2]  }
  0x12   : > { %s1248_s17 = sshll.u32 (!%p216_p9), %s1316_s16, 4  ;;  %s1249_s17 = int_to_ptr.vmem [resolvable:$false] %s1248_s17 }
  0x13   : > { %v259_v0 = vld [vmem:[%s1580_s2] sm:$0xff]  ;;  %v1306_v1 = vmov 0   ;;  %s246_s11 = scalar_select %p245_p10, %s1374_s25, 3  ;;  %vm265_vm0 = vcmask 130048   ;;  %v1307_v9 = vmov 1966171168   ;;  %v330_v11 = vlaneseq }
  0x14   : > { %301 = vmatprep.mubr.bf16.mxu0 %v1306_v1  ;;  %1233 = vset.pattern.permute.xlu0 %v1306_v1  ;;  %v252_v8 = vld [vmem:[%s1579_s1] sm:$0xf]  ;;  %v328_v10 = vunpack.c.l.s4 %v1307_v9  ;;  %v1013_v47 = vld [vmem:[%s1582_s4 + $0x8] sm:$0xff]  ;;  %vm409_vm3 = vcmask 1043456   ;;  %vm379_vm4 = vcmask 138240   ;;  %vm405_vm5 = vcmask 64512  }
  0x15   : > { %262 = vperm.xlu0 %1233, %v259_v0   ;;  %447 = vmatprep.mubr.bf16.mxu1 %v1306_v1  ;;  %s1181_s12 = sshll.u32 %s246_s11, 5  ;;  %v1132_v12 = vld.sshfl [vmem:[%s1583_s5] sm:$0x11 pattern:$0x75316420]  ;;  %v331_v14 = vshrl.u32 %v330_v11, 7 }
  0x16   : > { %1234 = vset.pattern.permute.xlu1 %v1306_v1  ;;  %s249_s15 = scalar_lea.vmem %s1578_s0, %s1181_s12  ;;  %v329_v13 = vunpack.c.0.s8 %v328_v10  ;;  %v326_v15 = vcombine.high %v1132_v12, %v1132_v12  ;;  %s1314_s11 = smov 112   ;;  %v1012_v48 = vld [vmem:[%s1582_s4] sm:$0xff]  ;;  %v1235_v55 = vld [vmem:[%s1581_s3 + $0x8] sm:$0xff]   ;;  %vm520_vm6 = vcmask 121856   ;;  %vm592_vm7 = vcmask 7168  }
  0x17   : > { %v1413_v2 = vld [vmem:[%s249_s15 + $0x8] sm:$0xff]  ;;  %v1415_v3 = vld [vmem:[%s249_s15 + $0x18] sm:$0xff]  ;;  %v1417_v4 = vld [vmem:[%s249_s15] sm:$0xff]  ;;  %v346_v28 = vsub.s32 0, %v331_v14  ;;  %s1315_s12 = smov 111   ;;  %vm728_vm8 = vcmask 1039360  }
  0x18   : > { %v258_v5 = vpack.c.bf16 %v1415_v3, %v1413_v2  ;;  %v1421_v6 = vld [vmem:[%s249_s15 + $0x10] sm:$0xff]  ;;  %v332_v16 = vsub.s32 %v329_v13, %v331_v14  ;;  %v1236_v61 = vld [vmem:[%s1581_s3] sm:$0xff]   ;;  %vm800_vm9 = vcmask 924672   ;;  %vm872_vm10 = vcmask 916480   ;;  %s1250_s18 = scalar_lea.vmem %s1249_s17, 1024 }
  0x19   : > { %v257_v7 = vpack.c.bf16 %v1421_v6, %v1417_v4  ;;  %vm944_vm11 = vcmask 908288  }
  0x1a   : > { %283 = vmatprep.subr.bf16.mxu0 %v258_v5  ;;  %v340_v18 = vrot.slane %v326_v15, %v332_v16  ;;  %v333_v20 = vrot.slane %v1132_v12, %v332_v16  ;;  %v1238_v15 = vld [vmem:[%s1581_s3 + $0x18] sm:$0xff]  }
  0x1b   : > { %284 = vmatpush1.bf16.msra.mxu0 %v257_v7 }
  0x1c   : > { %v349_v23 = vpack.i.b16 %v340_v18, %v340_v18  ;;  %v364_v24 = vshrl.u32 %v340_v18, 16  ;;  %v342_v29 = vpack.i.b16 %v333_v20, %v333_v20  ;;  %v357_v30 = vshrl.u32 %v333_v20, 16 }
  0x1e   : > { %1131 = vmatmul.mubr.msk.bf16.vlgmr.msra.gmra.mxu0 %vm265_vm0, %v252_v8  ;;  %v354_v35 = vrot.slane %v349_v23, %v346_v28  ;;  %v365_v36 = vpack.i.b16 %v364_v24, %v364_v24  ;;  %v347_v39 = vrot.slane %v342_v29, %v346_v28  ;;  %v358_v40 = vpack.i.b16 %v357_v30, %v357_v30  ;;  %v1237_v8 = vld [vmem:[%s1581_s3 + $0x10] sm:$0xff]  }
  0x1f   : > { %503 = vmatprep.mubr.bf16.mxu0 %v1306_v1 }
  0x20   : > { %v370_v42 = vrot.slane %v365_v36, %v346_v28  ;;  %v363_v44 = vrot.slane %v358_v40, %v346_v28 }
  0x90   : > { %v263_v17 = vpop.permute.xlu0 %262 }
  0xde   : > { %v303_v19 = vpop.f32.mrf.mxu0 }
  0xdf   : > { %v304_v21 = vadd.f32 %v303_v19, %v263_v17 }
  0xe0   : > { %v305_v22 = vpop.f32.mrf.mxu0 }
  0xe1   : > { %vm310_vm1 = vcmp.gt.f32.partialorder %v304_v21, 0.0  ;;  %v312_v25 = vmul.f32 0.1, %v304_v21  ;;  %v306_v26 = vadd.f32 %v305_v22, %v263_v17 }
  0xe2   : > { %v307_v27 = vpop.f32.mrf.mxu0 }
  0xe3   : > { %v314_v31 = vsel %vm310_vm1, %v304_v21, %v312_v25  ;;  %vm311_vm2 = vcmp.gt.f32.partialorder %v306_v26, 0.0  ;;  %v313_v32 = vmul.f32 0.1, %v306_v26  ;;  %v1239_v21 = vld [vmem:[%s1581_s3 + $0x20] sm:$0xff]   ;;  %v1240_v27 = vld [vmem:[%s1581_s3 + $0x28] sm:$0xff]  }
  0xe4   : > { %v1433_v33 = vpack.c.bf16 %v314_v31, %v314_v31  ;;  %v308_v34 = vpop.f32.mrf.mxu0 }
  0xe5   : > { %v315_v37 = vsel %vm311_vm2, %v306_v26, %v313_v32 }
  0xe6   : > { %v1435_v38 = vpack.c.bf16 %v315_v37, %v315_v37  ;;  %389 = vrot.lane.b32.xlu0 %v1433_v33, %s1308_s20  ;;  %v355_v43 = vmul.bf16 %v347_v39, %v1433_v33  ;;  %v371_v46 = vmul.bf16 %v363_v44, %v1433_v33  ;;  %v672_v14 = vsel %vm409_vm3, %v1433_v33, 0  ;;  %v1243_v39 = vld [vmem:[%s1581_s3 + $0x40] sm:$0xff]  }
  0xe8   : > { %391 = vrot.lane.b32.xlu1 %v1435_v38, %s1308_s20  ;;  %v356_v41 = vmul.bf16 %v354_v35, %v1435_v38  ;;  %v372_v45 = vmul.bf16 %v370_v42, %v1435_v38 }
  0xea   : > { %377 = vrot.lane.b32.xlu0 %v356_v41, %s1309_s26 }
  0xec   : > { %375 = vrot.lane.b32.xlu1 %v355_v43, %s1309_s26 }
  0xee   : > { %518 = vrot.lane.b32.xlu0 %v372_v45, %s1310_s28 }
  0xf0   : > { %516 = vrot.lane.b32.xlu1 %v371_v46, %s1310_s28  ;;  %s242_s28 = sand.u32 1, %s1296_s22  }
  0xf2   : > { %590 = vrot.lane.b32.xlu0 %v356_v41, %s1311_s29 }
  0xf4   : > { %588 = vrot.lane.b32.xlu1 %v355_v43, %s1311_s29  ;;  %s1128_s29 = sshll.u32 %s242_s28, 5 }
  0xf6   : > { %726 = vrot.lane.b32.xlu0 %v372_v45, %s1312_s9 }
  0xf8   : > { %724 = vrot.lane.b32.xlu1 %v371_v46, %s1312_s9  ;;  %s244_s9 = scalar_lea.vmem [#allocation2], %s1128_s29 }
  0xfa   : > { %798 = vrot.lane.b32.xlu0 %v356_v41, %s1313_s10 }
  0xfc   : > { %796 = vrot.lane.b32.xlu1 %v355_v43, %s1313_s10  ;;  %s1182_s10 = sshll.u32 %s1374_s25, 9  ;;  %s1537_s25 = scalar_lea.sflag [#allocation3], %s242_s28 }
  0xfd   : > { %s1530_s14 = scalar_lea.hbm %s1584_s6, %s1182_s10 }
  0xfe   : > { %870 = vrot.lane.b32.xlu0 %v1435_v38, %s1314_s11 }
 0x100   : > { %868 = vrot.lane.b32.xlu1 %v1433_v33, %s1314_s11  ;;  %v1241_v33 = vld [vmem:[%s1581_s3 + $0x30] sm:$0xff]   ;;  %s1062_s11 = sshll.u32 %s244_s9, 4  ;;  %s1533_s11 = int_to_ptr.vmem [resolvable:$true] %s1062_s11 }
 0x101   : > { %s1244_s15 = scalar_lea.vmem %s1533_s11, 512  ;;  %p1251_p0 = scmp.lt.s32.totalorder %s1533_s11, %s1249_s17 }
 0x102   : > { %942 = vrot.lane.b32.xlu0 %v372_v45, %s1315_s12  ;;  %p1245_p11 = scmp.ne.s32.totalorder %s1533_s11, %s1244_s15  ;;  %p1252_p1 = scmp.lt.s32.totalorder %s1250_s18, %s1244_s15 }
 0x104   : > { %940 = vrot.lane.b32.xlu1 %v371_v46, %s1315_s12  ;;  %p1246_p12 = pnand %p1245_p11, %p1391_p5  ;;  %p1253_p2 = por %p1252_p1, %p1251_p0 }
 0x106   : > { %1021 = vperm.xlu0 %1233, %v1013_v47   ;;  %p1247_p13 = pneg %p1246_p12 }
 0x108   : > { %1016 = vperm.xlu1 %1234, %v1012_v48   ;;  %p1254_p3 = pnand %p1253_p2, %p1247_p13 }
 0x158   : > { %v390_v49 = vpop.permute.xlu0 %389 }
 0x159   : > { %v396_v50 = vsel %vm265_vm0, 0, %v390_v49 }
 0x15a   : > { %v392_v51 = vpop.permute.xlu1 %391  ;;  %v410_v54 = vsel %vm409_vm3, %v396_v50, 0 }
 0x15b   : > { %v394_v52 = vsel %vm265_vm0, %v390_v49, %v392_v51 }
 0x15c   : > { %1136 = vmatprep.subr.msk.bf16.mxu1 %vm409_vm3, %v394_v52  ;;  %v378_v53 = vpop.permute.xlu0 %377 }
 0x15d   : > { %430 = vmatpush1.bf16.msra.mxu1 %v410_v54 }
 0x15e   : > { %v376_v56 = vpop.permute.xlu1 %375 }
 0x15f   : > { %v380_v57 = vsel %vm379_vm4, %v376_v56, %v378_v53  ;;  %v384_v58 = vsel %vm379_vm4, 0, %v376_v56 }
 0x160   : > { %v466_v59 = vsel %vm409_vm3, %v384_v58, 0  ;;  %1137 = vmatmul.mubr.msk.bf16.vlgmr.msra.gmra.mxu1 %vm405_vm5, %v1235_v55  ;;  %v519_v60 = vpop.permute.xlu0 %518  ;;  %1139 = vmatprep.subr.msk.bf16.mxu0 %vm409_vm3, %v380_v57 }
 0x161   : > { %486 = vmatpush1.bf16.msra.mxu0 %v466_v59  ;;  %573 = vmatprep.mubr.bf16.mxu1 %v1306_v1 }
 0x162   : > { %v517_v62 = vpop.permute.xlu1 %516 }
 0x163   : > { %v521_v63 = vsel %vm520_vm6, %v517_v62, %v519_v60  ;;  %v524_v0 = vsel %vm520_vm6, 0, %v517_v62 }
 0x164   : > { %v536_v5 = vsel %vm409_vm3, %v524_v0, 0  ;;  %v591_v7 = vpop.permute.xlu0 %590  ;;  %1140 = vmatmul.mubr.msk.bf16.vlgmr.msra.gmra.mxu0 %vm405_vm5, %v1236_v61  ;;  %1144 = vmatprep.subr.msk.bf16.mxu1 %vm409_vm3, %v521_v63 }
 0x165   : > { %556 = vmatpush1.bf16.msra.mxu1 %v536_v5  ;;  %645 = vmatprep.mubr.bf16.mxu0 %v1306_v1 }
 0x166   : > { %1154 = vmatprep.subr.msk.bf16.mxu1 %vm409_vm3, %v1435_v38  ;;  %v589_v9 = vpop.permute.xlu1 %588  ;;  %v1242_v38 = vld [vmem:[%s1581_s3 + $0x38] sm:$0xff]  }
 0x167   : > { %v593_v10 = vsel %vm592_vm7, %v589_v9, %v591_v7  ;;  %v596_v11 = vsel %vm592_vm7, 0, %v589_v9 }
 0x168   : > { %v608_v12 = vsel %vm409_vm3, %v596_v11, 0  ;;  %v727_v13 = vpop.permute.xlu0 %726  ;;  %1145 = vmatmul.mubr.msk.bf16.vlgmr.msra.gmra.mxu1 %vm405_vm5, %v1237_v8  ;;  %1149 = vmatprep.subr.msk.bf16.mxu0 %vm409_vm3, %v593_v10 }
 0x169   : > { %v732_v16 = vsel %vm728_vm8, %v727_v13, 0  ;;  %628 = vmatpush1.bf16.msra.mxu0 %v608_v12  ;;  %692 = vmatpush1.bf16.msra.mxu1 %v672_v14 }
 0x16a   : > { %1159 = vmatprep.subr.msk.bf16.mxu0 %vm409_vm3, %v732_v16  ;;  %v725_v17 = vpop.permute.xlu1 %724  ;;  %709 = vmatprep.mubr.bf16.mxu1 %v1306_v1 }
 0x16b   : > { %v729_v18 = vsel %vm728_vm8, %v725_v17, %v727_v13 }
 0x16c   : > { %v745_v19 = vsel %vm409_vm3, %v729_v18, 0  ;;  %v799_v20 = vpop.permute.xlu0 %798  ;;  %1150 = vmatmul.mubr.msk.bf16.vlgmr.msra.gmra.mxu0 %vm405_vm5, %v1238_v15 }
 0x16d   : > { %v804_v22 = vsel %vm800_vm9, %v799_v20, 0  ;;  %764 = vmatpush1.bf16.msra.mxu0 %v745_v19  ;;  %781 = vmatprep.mubr.bf16.mxu0 %v1306_v1 }
 0x16e   : > { %1164 = vmatprep.subr.msk.bf16.mxu1 %vm409_vm3, %v804_v22  ;;  %v797_v23 = vpop.permute.xlu1 %796 }
 0x16f   : > { %v801_v24 = vsel %vm800_vm9, %v797_v23, %v799_v20 }
 0x170   : > { %v817_v25 = vsel %vm409_vm3, %v801_v24, 0  ;;  %v871_v26 = vpop.permute.xlu0 %870  ;;  %1155 = vmatmul.mubr.msk.bf16.vlgmr.msra.gmra.mxu1 %vm405_vm5, %v1239_v21 }
 0x171   : > { %v876_v28 = vsel %vm872_vm10, %v871_v26, 0  ;;  %836 = vmatpush1.bf16.msra.mxu1 %v817_v25  ;;  %853 = vmatprep.mubr.bf16.mxu1 %v1306_v1 }
 0x172   : > { %1169 = vmatprep.subr.msk.bf16.mxu0 %vm409_vm3, %v876_v28  ;;  %v869_v29 = vpop.permute.xlu1 %868 }
 0x173   : > { %v873_v30 = vsel %vm872_vm10, %v869_v29, %v871_v26 }
 0x174   : > { %v889_v31 = vsel %vm409_vm3, %v873_v30, 0  ;;  %v943_v32 = vpop.permute.xlu0 %942  ;;  %1160 = vmatmul.mubr.msk.bf16.vlgmr.msra.gmra.mxu0 %vm405_vm5, %v1240_v27 }
 0x175   : > { %v948_v34 = vsel %vm944_vm11, %v943_v32, 0  ;;  %908 = vmatpush1.bf16.msra.mxu0 %v889_v31  ;;  %925 = vmatprep.mubr.bf16.mxu0 %v1306_v1 }
 0x176   : > { %1174 = vmatprep.subr.msk.bf16.mxu1 %vm409_vm3, %v948_v34  ;;  %v941_v35 = vpop.permute.xlu1 %940 }
 0x177   : > { %v945_v36 = vsel %vm944_vm11, %v941_v35, %v943_v32 }
 0x178   : > { %v961_v37 = vsel %vm409_vm3, %v945_v36, 0  ;;  %1165 = vmatmul.mubr.msk.bf16.vlgmr.msra.gmra.mxu1 %vm405_vm5, %v1241_v33 }
 0x179   : > { %980 = vmatpush1.bf16.msra.mxu1 %v961_v37  ;;  %997 = vmatprep.mubr.bf16.mxu1 %v1306_v1 }
 0x17c   : > { %1170 = vmatmul.mubr.msk.bf16.vlgmr.msra.gmra.mxu0 %vm405_vm5, %v1242_v38 }
 0x180   : > { %1175 = vmatmul.mubr.msk.bf16.vlgmr.msra.gmra.mxu1 %vm405_vm5, %v1243_v39 }
 0x183   : > { %v1017_v31 = vpop.permute.xlu1 %1016 }
 0x220   : > { %v449_v40 = vpop.f32.mrf.mxu1 }
 0x222   : > { %v451_v41 = vpop.f32.mrf.mxu1 }
 0x224   : > { %v453_v42 = vpop.f32.mrf.mxu1  ;;  %v505_v43 = vpop.f32.mrf.mxu0 }
 0x225   : > { %v506_v57 = vadd.f32 %v505_v43, %v449_v40 }
 0x226   : > { %v455_v44 = vpop.f32.mrf.mxu1  ;;  %v507_v45 = vpop.f32.mrf.mxu0 }
 0x227   : > { %v508_v60 = vadd.f32 %v507_v45, %v451_v41 }
 0x228   : > { %v509_v46 = vpop.f32.mrf.mxu0  ;;  %v575_v47 = vpop.f32.mrf.mxu1 }
 0x229   : > { %v584_v61 = vadd.f32 %v575_v47, %v506_v57  ;;  %v510_v0 = vadd.f32 %v509_v46, %v453_v42 }
 0x22a   : > { %v511_v48 = vpop.f32.mrf.mxu0  ;;  %v577_v49 = vpop.f32.mrf.mxu1 }
 0x22b   : > { %v585_v5 = vadd.f32 %v577_v49, %v508_v60  ;;  %v512_v13 = vadd.f32 %v511_v48, %v455_v44  ;;  %v1022_v49 = vpop.permute.xlu0 %1021 }
 0x22c   : > { %v579_v50 = vpop.f32.mrf.mxu1  ;;  %v647_v1 = vpop.f32.mrf.mxu0 }
 0x22d   : > { %v656_v7 = vadd.f32 %v647_v1, %v584_v61  ;;  %v586_v10 = vadd.f32 %v579_v50, %v510_v0 }
 0x22e   : > { %v581_v51 = vpop.f32.mrf.mxu1  ;;  %v649_v52 = vpop.f32.mrf.mxu0 }
 0x22f   : > { %v657_v11 = vadd.f32 %v649_v52, %v585_v5  ;;  %v587_v19 = vadd.f32 %v581_v51, %v512_v13 }
 0x230   : > { %v651_v53 = vpop.f32.mrf.mxu0  ;;  %v711_v54 = vpop.f32.mrf.mxu1 }
 0x231   : > { %v720_v12 = vadd.f32 %v711_v54, %v656_v7  ;;  %v658_v16 = vadd.f32 %v651_v53, %v586_v10 }
 0x232   : > { %v653_v55 = vpop.f32.mrf.mxu0  ;;  %v713_v56 = vpop.f32.mrf.mxu1 }
 0x233   : > { %v721_v17 = vadd.f32 %v713_v56, %v657_v11  ;;  %v659_v25 = vadd.f32 %v653_v55, %v587_v19 }
 0x234   : > { %v715_v58 = vpop.f32.mrf.mxu1  ;;  %v783_v59 = vpop.f32.mrf.mxu0 }
 0x235   : > { %v792_v18 = vadd.f32 %v783_v59, %v720_v12  ;;  %v722_v22 = vadd.f32 %v715_v58, %v658_v16 }
 0x236   : > { %v717_v62 = vpop.f32.mrf.mxu1  ;;  %v785_v63 = vpop.f32.mrf.mxu0 }
 0x237   : > { %v793_v23 = vadd.f32 %v785_v63, %v721_v17  ;;  %v723_v32 = vadd.f32 %v717_v62, %v659_v25 }
 0x238   : > { %v787_v8 = vpop.f32.mrf.mxu0  ;;  %v855_v9 = vpop.f32.mrf.mxu1 }
 0x239   : > { %v864_v24 = vadd.f32 %v855_v9, %v792_v18  ;;  %v794_v28 = vadd.f32 %v787_v8, %v722_v22 }
 0x23a   : > { %v789_v14 = vpop.f32.mrf.mxu0  ;;  %v857_v15 = vpop.f32.mrf.mxu1 }
 0x23b   : > { %v865_v29 = vadd.f32 %v857_v15, %v793_v23  ;;  %v795_v38 = vadd.f32 %v789_v14, %v723_v32 }
 0x23c   : > { %v859_v20 = vpop.f32.mrf.mxu1  ;;  %v927_v21 = vpop.f32.mrf.mxu0 }
 0x23d   : > { %v936_v30 = vadd.f32 %v927_v21, %v864_v24  ;;  %v866_v35 = vadd.f32 %v859_v20, %v794_v28 }
 0x23e   : > { %v861_v26 = vpop.f32.mrf.mxu1  ;;  %v929_v27 = vpop.f32.mrf.mxu0 }
 0x23f   : > { %v937_v36 = vadd.f32 %v929_v27, %v865_v29  ;;  %v867_v44 = vadd.f32 %v861_v26, %v795_v38 }
 0x240   : > { %v931_v33 = vpop.f32.mrf.mxu0  ;;  %v999_v34 = vpop.f32.mrf.mxu1 }
 0x241   : > { %v1008_v37 = vadd.f32 %v999_v34, %v936_v30  ;;  %v938_v40 = vadd.f32 %v931_v33, %v866_v35 }
 0x242   : > { %v1001_v39 = vpop.f32.mrf.mxu1  ;;  %v933_v41 = vpop.f32.mrf.mxu0 }
 0x243   : > { %v1009_v42 = vadd.f32 %v1001_v39, %v937_v36  ;;  %v1024_v43 = vadd.f32 %v1017_v31, %v1008_v37  ;;  %v939_v50 = vadd.f32 %v933_v41, %v867_v44 }
 0x244   : > { %v1003_v45 = vpop.f32.mrf.mxu1 }
 0x245   : > { %v1025_v46 = vadd.f32 %v1017_v31, %v1009_v42  ;;  %vm1028_vm12 = vcmp.gt.f32.partialorder %v1024_v43, 0.0  ;;  %v1032_v47 = vmul.f32 0.1, %v1024_v43  ;;  %v1010_v48 = vadd.f32 %v1003_v45, %v938_v40 }
 0x246   : > { %v1005_v1 = vpop.f32.mrf.mxu1 }
 0x247   : > { %vm1029_vm13 = vcmp.gt.f32.partialorder %v1025_v46, 0.0  ;;  %v1033_v51 = vmul.f32 0.1, %v1025_v46  ;;  %v1036_v52 = vsel %vm1028_vm12, %v1024_v43, %v1032_v47  ;;  %v1026_v53 = vadd.f32 %v1022_v49, %v1010_v48 }
 0x248   : > { %v1040_v54 = vadd.f32 %v1036_v52, %v1417_v4  ;;  %v1011_v55 = vadd.f32 %v1005_v1, %v939_v50 }
 0x249   : > { %v1037_v56 = vsel %vm1029_vm13, %v1025_v46, %v1033_v51  ;;  %vm1030_vm14 = vcmp.gt.f32.partialorder %v1026_v53, 0.0  ;;  %v1034_v57 = vmul.f32 0.1, %v1026_v53 }
 0x24a   : > { %v1041_v58 = vadd.f32 %v1037_v56, %v1413_v2  ;;  %1044 = vst [vmem:[%s244_s9] sm:$0xff] %v1040_v54  ;;  %v1027_v59 = vadd.f32 %v1022_v49, %v1011_v55 }
 0x24b   : > { %v1038_v60 = vsel %vm1030_vm14, %v1026_v53, %v1034_v57 }
 0x24c   : > { %1045 = vst [vmem:[%s244_s9 + $0x8] sm:$0xff] %v1041_v58  ;;  %v1042_v61 = vadd.f32 %v1038_v60, %v1421_v6  ;;  %vm1031_vm15 = vcmp.gt.f32.partialorder %v1027_v59, 0.0  ;;  %v1035_v62 = vmul.f32 0.1, %v1027_v59 }
 0x24e   : > { %1046 = vst [vmem:[%s244_s9 + $0x10] sm:$0xff] %v1042_v61  ;;  %v1039_v4 = vsel %vm1031_vm15, %v1027_v59, %v1035_v62 }
 0x24f   : > { %v1043_v2 = vadd.f32 %v1039_v4, %v1415_v3 }
 0x251   : > { %1047 = vst [vmem:[%s244_s9 + $0x18] sm:$0xff] %v1043_v2 }
 0x252   : > { %1257 = shalt.err (!%p1254_p3)
}
 0x253   : > { %s1258_s19 = scalar_lea.hbm %s1530_s14, 512  ;;  %s1262_s29 = scalar_lea.hbm %s1584_s6, 2048 }
 0x254   : > { %p1259_p4 = scmp.ne.s32.totalorder %s1530_s14, %s1258_s19  ;;  %p1263_p9 = scmp.lt.s32.totalorder %s1530_s14, %s1584_s6 }
 0x255   : > { %p1264_p10 = scmp.lt.s32.totalorder %s1262_s29, %s1258_s19 }
 0x256   : > { %p1260_p7 = pnand %p1259_p4, %p1391_p5 }
 0x257   : > { %p1265_p11 = por %p1264_p10, %p1263_p9 }
 0x258   : > { %p1261_p8 = pneg %p1260_p7 }
 0x25a   : > { %p1266_p12 = pnand %p1265_p11, %p1261_p8 }
 0x25c   : > { %1269 = shalt.err (!%p1266_p12)
}
 0x25d   : > { %s1317_s12 = smov 256  }
 0x25e   : > { %1183 = dma.vmem_to_hbm [thread:$0]  (%p1391_p5), %s1533_s11, 512, %s1530_s14, %s1537_s25, %s1317_s12, %s1317_s12, %s1308_s20  }
 0x25f PF: > { %p1189_p13 = scmp.ge.s32.totalorder %s1304_s24, 2  ;;  %s1077_s13 = sand.u32 1, %s1292_s21  }
 0x260   : > { %s1078_s15 = scalar_lea.sflag [#allocation3], %s1077_s13 }
 0x261   : > { %p1186_p0 = pnand %p1189_p13, %p1395_p6 }
 0x263   : > { %p1187_p1 = pneg %p1186_p0 }
 0x265   : > { %1287 = dma.done.wait (%p1187_p1), %s1078_s15, 512  }
 0x266   : > { %1289 = vsyncadd (%p1187_p1), %s1078_s15, 4294966784  ;;  %p16_p2 = scmp.ge.s32.totalorder %s1378_s27, 6   ;;  %s1587_s21 = smov %s1296_s22 }
 0x267   : > { %s1588_s22 = smov %s1300_s23  ;;  %s1589_s23 = smov %s1389_s30 }
 0x268   : > { %s1590_s24 = smov %s1378_s27  ;;  %18 = sbr.rel (!%p16_p2) target bundleno = 3 (0x3), region = 87 }
 0x26d   :  { %1083 = vsyncpa [#allocation3], 1 }
 0x26e   :  { %1085 = vsyncpa [#allocation3 + $0x1], 1 }

</bundles_post_ra>
